<compile_context>
chip_gen: v6e
topology: v6e:2x2x1
jax: 0.10.0
libtpu: 0.0.40
codegen_flags: <defaults>
</compile_context>

<pallas_src>
import functools

import jax
import jax.numpy as jnp
from jax.experimental import pallas as pl
from jax.experimental.pallas import tpu as pltpu


def _round_up(n, m):
    return ((n + m - 1) // m) * m


# --------------------------------------------------------------------------- #
# Kernel
# --------------------------------------------------------------------------- #
def _linear_head_kernel(x_ref, w_ref, b_ref, o_ref, acc_ref, *, tk):
    # x_ref: [tm, Hp]  full-H activation panel (resident across j and k)
    # w_ref: [tk, tn]  weight tile (bf16)
    # b_ref: [1,  tn]  bias (f32)
    # o_ref: [tm, tn]  output tile
    # acc_ref: [tm, tn] f32 accumulator scratch
    k = pl.program_id(2)

    @pl.when(k == 0)
    def _():
        acc_ref[...] = jnp.zeros_like(acc_ref)

    kk = pl.multiple_of(k * tk, tk)
    acc_ref[...] += jnp.dot(
        x_ref[:, pl.ds(kk, tk)],
        w_ref[...],
        preferred_element_type=jnp.float32,
    )

    @pl.when(k == pl.num_programs(2) - 1)
    def _():
        # Bias added exactly once, in f32, in the final-K epilogue.
        o_ref[...] = (acc_ref[...] + b_ref[...]).astype(o_ref.dtype)


# --------------------------------------------------------------------------- #
# Tile selection / VMEM budgeting
# --------------------------------------------------------------------------- #
def _choose_col_tiles(H, O):
    """Pick (tk, Hp, tn, Op): K/N tiles and padded extents."""
    Hp = _round_up(H, 128)
    if Hp <= 2048:
        tk = Hp
    else:
        tk = 2048
        Hp = _round_up(H, tk)
    Op = _round_up(O, 128)
    if Op <= 1024:
        tn = Op
    else:
        tn = 1024
        Op = _round_up(O, tn)
    return tk, Hp, tn, Op


def _choose_row_tile(M):
    """Pick (tm, Mp).  Small M -> one row block (W streamed exactly once);
    large M -> 512-row tiles (multiple of 256 to fill the v6e/v7x MXU)."""
    Mp = _round_up(M, 8)
    if Mp <= 512:
        return Mp, Mp
    tm = 512
    return tm, _round_up(M, tm)


def _vmem_limit_bytes(tm, tn, tk, Hp, out_itemsize, compute_itemsize=2):
    working_set = (
        2 * tm * Hp * compute_itemsize  # x panel (double-buffered)
        + 2 * tk * tn * compute_itemsize  # W tile (double-buffered)
        + 2 * 1 * tn * 4                # bias
        + 2 * tm * tn * out_itemsize    # output tile
        + tm * tn * 4                   # f32 accumulator scratch
    )
    # +25% slack for Mosaic internal scratch; clamp to <=48 MiB (v7x has 64 MiB).
    return min(max(int(working_set * 1.25) + (4 << 20), 32 << 20), 48 << 20)


# --------------------------------------------------------------------------- #
# pallas_call wrapper (operates on pre-padded 2-D arrays)
# --------------------------------------------------------------------------- #
@functools.partial(
    jax.jit,
    static_argnames=("tm", "tn", "tk", "M", "O", "out_dtype", "vmem_limit"),
)
def _forward_padded(x2d, w2d, b2d, *, tm, tn, tk, M, O, out_dtype, vmem_limit):
    Mp, Hp = x2d.shape
    _, Op = w2d.shape
    grid = (Mp // tm, Op // tn, Hp // tk)

    # Real streamed HBM bytes: W once per row block (x is resident across j/k),
    # x once, bias once per (i, j), plus the padded output writeback.
    bytes_accessed = (
        grid[0] * w2d.size * w2d.dtype.itemsize
        + x2d.size * x2d.dtype.itemsize
        + grid[0] * grid[1] * tn * b2d.dtype.itemsize
        + Mp * Op * jnp.dtype(out_dtype).itemsize
    )
    cost = pl.CostEstimate(
        flops=2 * M * Hp * O, transcendentals=0, bytes_accessed=bytes_accessed
    )

    return pl.pallas_call(
        functools.partial(_linear_head_kernel, tk=tk),
        out_shape=jax.ShapeDtypeStruct((Mp, Op), out_dtype),
        grid_spec=pltpu.PrefetchScalarGridSpec(
            num_scalar_prefetch=0,
            grid=grid,
            in_specs=[
                # Full-H activation panel, resident across the O and K axes.
                pl.BlockSpec((tm, Hp), lambda i, j, k: (i, 0)),
                # Weight tile, streamed along K (innermost) and O.
                pl.BlockSpec((tk, tn), lambda i, j, k: (k, j)),
                # Bias slice for this output-column tile.
                pl.BlockSpec((1, tn), lambda i, j, k: (0, j)),
            ],
            out_specs=pl.BlockSpec((tm, tn), lambda i, j, k: (i, j)),
            scratch_shapes=[pltpu.VMEM((tm, tn), jnp.float32)],
        ),
        compiler_params=pltpu.CompilerParams(
            dimension_semantics=("parallel", "parallel", "arbitrary"),
            vmem_limit_bytes=vmem_limit,
        ),
        cost_estimate=cost,
    )(x2d, w2d, b2d)


# --------------------------------------------------------------------------- #
# Output head (concrete realization of BaseOutputHead)
# --------------------------------------------------------------------------- #
class PallasLinearOutputHead:
    """Concrete linear output head: y = x @ W + b.

    Weights are cast to bf16 and zero-padded ONCE at construction so the
    (potentially vocab-scale) W never pays a per-call cast/pad HBM round trip.
    """

    def __init__(self, weight, bias, *, compute_dtype=jnp.bfloat16, out_dtype=None):
        H, O = weight.shape
        self.H, self.O = int(H), int(O)
        self.compute_dtype = compute_dtype
        self.out_dtype = out_dtype  # None -> follow x.dtype
        tk, Hp, tn, Op = _choose_col_tiles(self.H, self.O)
        self.tk, self.Hp, self.tn, self.Op = tk, Hp, tn, Op

        w = weight.astype(compute_dtype)
        if (Hp, Op) != (self.H, self.O):
            w = jnp.pad(w, ((0, Hp - self.H), (0, Op - self.O)))
        b = bias.reshape(1, self.O).astype(jnp.float32)
        if Op != self.O:
            b = jnp.pad(b, ((0, 0), (0, Op - self.O)))
        self.w2d = w
        self.b2d = b

    def __call__(self, x):
        B, S, H = x.shape
        assert H == self.H, f"hidden dim mismatch: {H} vs {self.H}"
        M = B * S
        out_dtype = self.out_dtype if self.out_dtype is not None else x.dtype
        tm, Mp = _choose_row_tile(M)

        x2d = x.reshape(M, H).astype(self.compute_dtype)
        if (Mp, self.Hp) != (M, H):
            x2d = jnp.pad(x2d, ((0, Mp - M), (0, self.Hp - H)))

        vmem_limit = _vmem_limit_bytes(
            tm, self.tn, self.tk, self.Hp, jnp.dtype(out_dtype).itemsize
        )
        out2d = _forward_padded(
            x2d, self.w2d, self.b2d,
            tm=tm, tn=self.tn, tk=self.tk,
            M=M, O=self.O, out_dtype=out_dtype, vmem_limit=vmem_limit,
        )
        if (Mp, self.Op) != (M, self.O):
            out2d = out2d[:M, : self.O]
        return out2d.reshape(B, S, self.O)


# --------------------------------------------------------------------------- #
# Demo / correctness check
# --------------------------------------------------------------------------- #
if __name__ == "__main__":
    key = jax.random.PRNGKey(0)

    # --- Case 1: small, non-tile-aligned shapes (exercises zero padding). ---
    B, S, H, O = 2, 8, 32, 40
    kx, kw, kb = jax.random.split(key, 3)
    x = jax.random.normal(kx, (B, S, H), dtype=jnp.float32)
    weight = jax.random.normal(kw, (H, O), dtype=jnp.float32) * 0.02
    bias = jax.random.normal(kb, (O,), dtype=jnp.float32) * 0.02

    head = PallasLinearOutputHead(weight, bias)
    y = head(x)
    jax.block_until_ready(y)
    assert y.shape == (B, S, O)

    # Reference using the same bf16-operand / f32-accumulate math.
    x_bf = x.astype(jnp.bfloat16).astype(jnp.float32)
    w_bf = weight.astype(jnp.bfloat16).astype(jnp.float32)
    y_ref = (x_bf.reshape(B * S, H) @ w_bf + bias).reshape(B, S, O)
    assert jnp.allclose(y, y_ref, atol=2e-3, rtol=2e-3)
    # Loose check against full-f32 reference (operand bf16 rounding only).
    y_f32 = (x.reshape(B * S, H) @ weight + bias).reshape(B, S, O)
    assert jnp.allclose(y, y_f32, atol=5e-2, rtol=5e-2)

    # --- Case 2: shapes large enough to exercise the multi-tile K/N grid,
    #     the f32 accumulator, and the in-kernel K-slice of the x panel. ---
    B2, S2, H2, O2 = 2, 8, 2560, 1536   # -> tk=2048, Hp=4096, tn=1024, Op=2048
    kx2, kw2, kb2 = jax.random.split(jax.random.PRNGKey(1), 3)
    x2 = jax.random.normal(kx2, (B2, S2, H2), dtype=jnp.float32)
    w2 = jax.random.normal(kw2, (H2, O2), dtype=jnp.float32) * 0.02
    b2 = jax.random.normal(kb2, (O2,), dtype=jnp.float32) * 0.02

    head2 = PallasLinearOutputHead(w2, b2)
    y2 = head2(x2)
    jax.block_until_ready(y2)
    assert y2.shape == (B2, S2, O2)

    x2_bf = x2.astype(jnp.bfloat16).astype(jnp.float32)
    w2_bf = w2.astype(jnp.bfloat16).astype(jnp.float32)
    y2_ref = (x2_bf.reshape(B2 * S2, H2) @ w2_bf + b2).reshape(B2, S2, O2)
    assert jnp.allclose(y2, y2_ref, atol=2e-2, rtol=2e-2)

    print("KERNEL_OK")
</pallas_src>

<mosaic_0001>
module attributes {stable_mosaic.version = 11 : i64} {
  func.func @_linear_head_kernel(%arg0: i32, %arg1: i32, %arg2: i32, %arg3: memref<16x128xbf16, #tpu.memory_space<vmem>>, %arg4: memref<128x128xbf16, #tpu.memory_space<vmem>>, %arg5: memref<1x128xf32, #tpu.memory_space<vmem>>, %arg6: memref<16x128xf32, #tpu.memory_space<vmem>>, %arg7: memref<16x128xf32, #tpu.memory_space<vmem>>) attributes {dimension_semantics = [#tpu.dimension_semantics<parallel>, #tpu.dimension_semantics<parallel>, #tpu.dimension_semantics<arbitrary>], iteration_bounds = array<i64: 1, 1, 1>, scalar_prefetch = 0 : i64, scratch_operands = 1 : i64, tpu.core_type = #tpu.core_type<tc>, window_params = [{transform_indices = @transform_0, window_bounds = array<i64: 16, 128>}, {transform_indices = @transform_1, window_bounds = array<i64: 128, 128>}, {transform_indices = @transform_2, window_bounds = array<i64: 1, 128>}, {transform_indices = @transform_3, window_bounds = array<i64: 16, 128>}]} {
    %c0_i32 = arith.constant 0 : i32
    %0 = arith.cmpi eq, %arg2, %c0_i32 : i32
    %1 = arith.extui %0 : i1 to i32
    %c0_i32_0 = arith.constant 0 : i32
    %2 = arith.cmpi ne, %1, %c0_i32_0 : i32
    scf.if %2 {
      %cst_9 = arith.constant 0.000000e+00 : f32
      %15 = vector.broadcast %cst_9 : f32 to vector<16x128xf32>
      %c0_10 = arith.constant 0 : index
      %c0_11 = arith.constant 0 : index
      %16 = vector.load %arg7[%c0_10, %c0_11] : memref<16x128xf32, #tpu.memory_space<vmem>>, vector<16x128xf32>
      tpu.vector_store %arg7[%c0_10, %c0_11], %15 {strides = array<i32>} : memref<16x128xf32, #tpu.memory_space<vmem>>, vector<16x128xf32>,
    } else {
    }
    %c128_i32 = arith.constant 128 : i32
    %3 = arith.muli %arg2, %c128_i32 : i32
    %4 = tpu.assume_multiple %3, 128 : i32
    %c0 = arith.constant 0 : index
    %c0_1 = arith.constant 0 : index
    %5 = vector.load %arg7[%c0, %c0_1] : memref<16x128xf32, #tpu.memory_space<vmem>>, vector<16x128xf32>
    %c0_2 = arith.constant 0 : index
    %6 = arith.index_cast %4 : i32 to index
    %7 = vector.load %arg3[%c0_2, %6] : memref<16x128xbf16, #tpu.memory_space<vmem>>, vector<16x128xbf16>
    %c0_3 = arith.constant 0 : index
    %c0_4 = arith.constant 0 : index
    %8 = vector.load %arg4[%c0_3, %c0_4] : memref<128x128xbf16, #tpu.memory_space<vmem>>, vector<128x128xbf16>
    %cst = arith.constant dense<0.000000e+00> : vector<16x128xf32>
    %9 = tpu.matmul %7, %8, %cst {dimension_numbers = #tpu.dot_dimension_numbers<[1], [0], [0], [1], [0, 0, 1, 1], [], []>} : vector<16x128xbf16>, vector<128x128xbf16>, vector<16x128xf32> -> vector<16x128xf32>
    %10 = arith.addf %5, %9 : vector<16x128xf32>
    %c0_5 = arith.constant 0 : index
    %c0_6 = arith.constant 0 : index
    %11 = vector.load %arg7[%c0_5, %c0_6] : memref<16x128xf32, #tpu.memory_space<vmem>>, vector<16x128xf32>
    tpu.vector_store %arg7[%c0_5, %c0_6], %10 {strides = array<i32>} : memref<16x128xf32, #tpu.memory_space<vmem>>, vector<16x128xf32>,
    %c0_i32_7 = arith.constant 0 : i32
    %12 = arith.cmpi eq, %arg2, %c0_i32_7 : i32
    %13 = arith.extui %12 : i1 to i32
    %c0_i32_8 = arith.constant 0 : i32
    %14 = arith.cmpi ne, %13, %c0_i32_8 : i32
    scf.if %14 {
      %c0_9 = arith.constant 0 : index
      %c0_10 = arith.constant 0 : index
      %15 = vector.load %arg7[%c0_9, %c0_10] : memref<16x128xf32, #tpu.memory_space<vmem>>, vector<16x128xf32>
      %c0_11 = arith.constant 0 : index
      %c0_12 = arith.constant 0 : index
      %16 = vector.load %arg5[%c0_11, %c0_12] : memref<1x128xf32, #tpu.memory_space<vmem>>, vector<1x128xf32>
      %17 = vector.broadcast %16 : vector<1x128xf32> to vector<16x128xf32>
      %18 = arith.addf %15, %17 : vector<16x128xf32>
      %c0_13 = arith.constant 0 : index
      %c0_14 = arith.constant 0 : index
      %19 = vector.load %arg6[%c0_13, %c0_14] : memref<16x128xf32, #tpu.memory_space<vmem>>, vector<16x128xf32>
      tpu.vector_store %arg6[%c0_13, %c0_14], %18 {strides = array<i32>} : memref<16x128xf32, #tpu.memory_space<vmem>>, vector<16x128xf32>,
    } else {
    }
    return
  }
  func.func @transform_0(%arg0: i32, %arg1: i32, %arg2: i32) -> (i32, i32) {
    %c0_i32 = arith.constant 0 : i32
    %c0_i32_0 = arith.constant 0 : i32
    return %arg0, %c0_i32 : i32, i32
  }
  func.func @transform_1(%arg0: i32, %arg1: i32, %arg2: i32) -> (i32, i32) {
    %c0_i32 = arith.constant 0 : i32
    return %arg2, %arg1 : i32, i32
  }
  func.func @transform_2(%arg0: i32, %arg1: i32, %arg2: i32) -> (i32, i32) {
    %c0_i32 = arith.constant 0 : i32
    %c0_i32_0 = arith.constant 0 : i32
    return %c0_i32, %arg1 : i32, i32
  }
  func.func @transform_3(%arg0: i32, %arg1: i32, %arg2: i32) -> (i32, i32) {
    %c0_i32 = arith.constant 0 : i32
    return %arg0, %arg1 : i32, i32
  }
}

</mosaic_0001>

<bundles_post_ra>
// kernel: _forward_padded.1
= control target key start
LH: loop header
LB: loop body
LE: loop exit
PB: predicated region body
PF: predicated region fallthrough
CT: control target
= control target key end

     0   :  { %8 = vsyncpa [#allocation4], 0  ;;  %s374_s0 = inlined_call_operand.hbm [shape: bf16[16,128], index: 0, kind: input, shape index: {}]   ;;  %s375_s1 = inlined_call_operand.hbm [shape: bf16[128,128], index: 1, kind: input, shape index: {}]   ;;  %s376_s2 = inlined_call_operand.vmem [shape: f32[1,128], index: 2, kind: input, shape index: {}]   ;;  %s377_s3 = inlined_call_operand.hbm [shape: f32[16,128], index: 3, kind: output, shape index: {}]  }
   0x1   :  { %9 = vsyncpa [#allocation7], 0 }
   0x2   :  { %10 = vsyncpa [#allocation5], 0  ;;  %s333_s12 = smov [#allocation3]  }
   0x3   :  { %s16_s13 = sshll.u32 %s333_s12, 4  ;;  %s17_s13 = int_to_ptr.vmem [resolvable:$true] %s16_s13 }
   0x4   :  { %s275_s14 = scalar_lea.vmem %s17_s13, 128  ;;  %p280_p1 = scmp.lt.s32.totalorder %s17_s13, %s17_s13 }
   0x5   :  { %p276_p0 = scmp.ne.s32.totalorder %s17_s13, %s275_s14  ;;  %p281_p2 = scmp.lt.s32.totalorder %s275_s14, %s275_s14 }
   0x7   :  { %p282_p3 = por %p281_p2, %p280_p1 }
   0x9   :  { %p283_p4 = pnand %p282_p3, %p276_p0 }
   0xb   :  { %286 = shalt.err (!%p283_p4)
}
   0xc   :  { %s334_s15 = smov 64   ;;  %s335_s16 = smov 4  }
   0xd   :  { %22 = dma.hbm_to_vmem [thread:$0]  %s374_s0, 128, %s17_s13, [#allocation4], %s334_s15, %s334_s15, %s335_s16  }
   0xe   :  { %s336_s19 = smov [#allocation6]  }
   0xf   :  { %s28_s20 = sshll.u32 %s336_s19, 4  ;;  %s29_s20 = int_to_ptr.vmem [resolvable:$true] %s28_s20 }
  0x10   :  { %s295_s21 = scalar_lea.vmem %s29_s20, 1024  ;;  %p300_p6 = scmp.lt.s32.totalorder %s29_s20, %s29_s20 }
  0x11   :  { %p296_p5 = scmp.ne.s32.totalorder %s29_s20, %s295_s21  ;;  %p301_p7 = scmp.lt.s32.totalorder %s295_s21, %s295_s21 }
  0x13   :  { %p302_p8 = por %p301_p7, %p300_p6 }
  0x15   :  { %p303_p9 = pnand %p302_p8, %p296_p5 }
  0x17   :  { %306 = shalt.err (!%p303_p9)
}
  0x18   :  { %34 = dma.hbm_to_vmem [thread:$0]  %s375_s1, 1024, %s29_s20, [#allocation7], %s334_s15, %s334_s15, %s335_s16  }
  0x19   :  { %327 = dma.done.wait [#allocation4], 128  }
  0x1a   :  { %328 = vsyncadd [#allocation4], 4294967168 }
  0x1b   :  { %329 = dma.done.wait [#allocation7], 1024  }
  0x1c   :  { %330 = vsyncadd [#allocation7], 4294966272  ;;  %v337_v0 = vmov 0.0   ;;  %vm338_vm0 = vmmov 0   ;;  %v258_v1 = vld [vmem:[#allocation6 + $0x38] sm:$0xff]   ;;  %v259_v2 = vld [vmem:[#allocation6 + $0x30] sm:$0xff]  }
  0x1d   :  { %229 = vmatprep.subr.bf16.mxu0 %v337_v0  ;;  %245 = vmatprep.mubr.msk.bf16.mxu0 %vm338_vm0, %v337_v0  ;;  %v260_v3 = vld [vmem:[#allocation6 + $0x28] sm:$0xff]   ;;  %v261_v4 = vld [vmem:[#allocation6 + $0x20] sm:$0xff]   ;;  %v262_v5 = vld [vmem:[#allocation6 + $0x18] sm:$0xff]   ;;  %s339_s24 = smov [#allocation8]  }
  0x1e   :  { %230 = vmatpush3.bf16.msra.mxu0 %v258_v1  ;;  %v263_v6 = vld [vmem:[#allocation6 + $0x10] sm:$0xff]   ;;  %v264_v7 = vld [vmem:[#allocation6 + $0x8] sm:$0xff]   ;;  %v265_v8 = vld [vmem:[#allocation6] sm:$0xff]   ;;  %s195_s25 = sshll.u32 %s339_s24, 4  ;;  %s196_s25 = int_to_ptr.vmem [resolvable:$true] %s195_s25 }
  0x1f   :  { %231 = vmatprep.subr.bf16.mxu0 %v337_v0  ;;  %v266_v9 = vld [vmem:[#allocation3] sm:$0xff]   ;;  %s307_s26 = scalar_lea.vmem %s196_s25, 256  ;;  %p312_p11 = scmp.lt.s32.totalorder %s196_s25, %s196_s25 }
  0x20   :  { %v219_v10 = vld [vmem:[%s376_s2] ss:$0 sm:$0xff]  ;;  %p308_p10 = scmp.ne.s32.totalorder %s196_s25, %s307_s26  ;;  %p313_p12 = scmp.lt.s32.totalorder %s307_s26, %s307_s26 }
  0x22   :  { %232 = vmatpush3.bf16.msra.mxu0 %v259_v2  ;;  %p314_p13 = por %p313_p12, %p312_p11 }
  0x23   :  { %233 = vmatprep.subr.bf16.mxu0 %v337_v0 }
  0x24   :  { %p315_p0 = pnand %p314_p13, %p308_p10 }
  0x26   :  { %234 = vmatpush3.bf16.msra.mxu0 %v260_v3 }
  0x27   :  { %235 = vmatprep.subr.bf16.mxu0 %v337_v0 }
  0x2a   :  { %236 = vmatpush3.bf16.msra.mxu0 %v261_v4 }
  0x2b   :  { %237 = vmatprep.subr.bf16.mxu0 %v337_v0 }
  0x2e   :  { %238 = vmatpush3.bf16.msra.mxu0 %v262_v5 }
  0x2f   :  { %239 = vmatprep.subr.bf16.mxu0 %v337_v0 }
  0x32   :  { %240 = vmatpush3.bf16.msra.mxu0 %v263_v6 }
  0x33   :  { %241 = vmatprep.subr.bf16.mxu0 %v337_v0 }
  0x36   :  { %242 = vmatpush3.bf16.msra.mxu0 %v264_v7 }
  0x37   :  { %243 = vmatprep.subr.bf16.mxu0 %v337_v0 }
  0x3a   :  { %244 = vmatpush3.bf16.msra.mxu0 %v265_v8 }
  0x3d   :  { %246 = vmatmul.mubr.bf16.vlgmr.msra.gmra.mxu0 %v266_v9 }
  0xfd   :  { %v163_v11 = vpop.f32.mrf.mxu0 }
  0xfe   :  { %v186_v12 = vadd.f32 %v219_v10, %v163_v11 }
  0xff   :  { %v247_v13 = vpop.f32.mrf.mxu0 }
 0x100   :  { %188 = vst [vmem:[#allocation8] sm:$0xff] %v186_v12 }
 0x101   :  { %v166_v14 = vpop.f32.mrf.mxu0 }
 0x102   :  { %v187_v15 = vadd.f32 %v219_v10, %v166_v14 }
 0x103   :  { %v248_v16 = vpop.f32.mrf.mxu0 }
 0x104   :  { %189 = vst [vmem:[#allocation8 + $0x8] sm:$0xff] %v187_v15 }
 0x105   :  { %318 = shalt.err (!%p315_p0)
}
 0x106   :  { %s340_s27 = smov 128   ;;  %s341_s2 = smov 8  }
 0x107   :  { %201 = dma.vmem_to_hbm [thread:$0]  %s196_s25, 256, %s377_s3, [#allocation5], %s340_s27, %s340_s27, %s341_s2  }
 0x108   :  { %331 = dma.done.wait [#allocation5], 256  }
 0x109   :  { %332 = vsyncadd [#allocation5], 4294967040 }
 0x10a   :  { %205 = vsyncpa [#allocation4], 1 }
 0x10b   :  { %206 = vsyncpa [#allocation7], 1 }
 0x10c   :  { %207 = vsyncpa [#allocation5], 1 }

</bundles_post_ra>
